<compile_context>
chip_gen: v7x
topology: tpu7x:2x2x1
jax: 0.10.0
libtpu: 0.0.40
codegen_flags: <defaults>
</compile_context>

<pallas_src>
import jax
import jax.numpy as jnp
import numpy as np
from jax.experimental import pallas as pl
from jax.experimental.pallas import tpu as pltpu

_NCORES = 2  # "parallel" grid axis -> both TensorCores on v7x; serial elsewhere.


def _pick_bm(n, c, itemsize):
    """Row tile: ~1 MiB of logits per block, sublane aligned, no taller than a core's share."""
    mult = 16 if itemsize < 4 else 8          # sub-32-bit dtypes pack rows along sublanes
    target = (1 << 20) // max(1, c * itemsize)
    bm = max(mult, min(1024, target))
    bm = (bm // mult) * mult
    per_core = -(-n // _NCORES)               # cdiv(n, NCORES)
    per_core = ((per_core + mult - 1) // mult) * mult
    return int(max(mult, min(bm, per_core)))


def _make_kernel(n, c, bm, tiles_per_core):
    def kernel(logits_ref, targets_ref, out_ref):
        core = pl.program_id(0)   # "parallel" axis (megacore split on v7x)
        i = pl.program_id(1)      # "arbitrary" reduction axis

        @pl.when(i == 0)
        def _init():
            out_ref[...] = jnp.zeros_like(out_ref)

        lg = logits_ref[...].astype(jnp.float32)   # (bm, c); per-tile cast is free (VPU)
        tg = targets_ref[...]                      # (bm, 1) int32; -1 = unknown / padding

        # Global row ids of this tile (unclamped block id) -> mask rows beyond N.
        row0 = (core * tiles_per_core + i) * bm
        rows = row0 + jax.lax.broadcasted_iota(jnp.int32, (bm, 1), 0)
        valid = rows < n                           # (bm, 1)

        known = jnp.logical_and(tg != -1, valid)   # (bm, 1)
        unknown = jnp.logical_and(tg == -1, valid)

        # gather logits[row, target[row]] via one-hot masked row-sum
        col = jax.lax.broadcasted_iota(jnp.int32, (bm, c), 1)
        onehot = col == tg                         # all-False when tg == -1 (pad/unknown)
        gathered = jnp.sum(jnp.where(onehot, lg, 0.0), axis=1, keepdims=True)   # (bm, 1)
        exp_known = jnp.where(known, jnp.exp(gathered), 0.0)                    # (bm, 1)
        cnt_known = known.astype(jnp.float32)                                   # (bm, 1)

        # positive logits of unknown rows
        pos = jnp.logical_and(unknown, lg > 0.0)                                # (bm, c)
        pos_sum = jnp.sum(jnp.where(pos, lg, 0.0), axis=1, keepdims=True)       # (bm, 1)
        pos_cnt = jnp.sum(pos.astype(jnp.float32), axis=1, keepdims=True)       # (bm, 1)

        # Pack the four per-row partials into lanes 0..3 (broadcast + select only;
        # no per-step cross-lane reduce, no scalar/SMEM round-trips).
        lane4 = jax.lax.broadcasted_iota(jnp.int32, (bm, 4), 1)
        upd = jnp.where(lane4 == 0, exp_known,
              jnp.where(lane4 == 1, cnt_known,
              jnp.where(lane4 == 2, pos_sum, pos_cnt)))
        out_ref[...] = out_ref[...] + upd          # resident VMEM accumulator (bm, 4)

    return kernel


def open_set_loss(logits, targets):
    # mirror torch's `if len(logits.shape) > 2: logits = logits.squeeze(0)`
    while logits.ndim > 2 and logits.shape[0] == 1:
        logits = logits[0]
    n, c = logits.shape
    itemsize = jnp.dtype(logits.dtype).itemsize

    bm = _pick_bm(n, c, itemsize)
    nblocks = -(-n // bm)                 # cdiv(n, bm)
    tpc = -(-nblocks // _NCORES)          # tiles per core
    n_pad = _NCORES * tpc * bm
    last_block = nblocks - 1

    # Targets padded with -1 (unknown) so overhanging / duplicated tiles add nothing.
    t = jnp.full((n_pad,), -1, dtype=jnp.int32)
    t = t.at[:n].set(targets.reshape(-1).astype(jnp.int32)).reshape(n_pad, 1)

    out = pl.pallas_call(
        _make_kernel(n, c, bm, tpc),
        out_shape=jax.ShapeDtypeStruct((_NCORES, bm, 4), jnp.float32),
        grid=(_NCORES, tpc),
        in_specs=[
            # logits streamed in native dtype; clamp overhanging block ids to the last block
            pl.BlockSpec((bm, c),
                         lambda core, i: (jnp.minimum(core * tpc + i, last_block), 0)),
            pl.BlockSpec((bm, 1), lambda core, i: (core * tpc + i, 0)),
        ],
        # per-core resident accumulator block (revisited across the "arbitrary" axis)
        out_specs=pl.BlockSpec((None, bm, 4), lambda core, i: (core, 0, 0)),
        compiler_params=pltpu.CompilerParams(
            dimension_semantics=("parallel", "arbitrary"),
            vmem_limit_bytes=32 * 1024 * 1024),
        cost_estimate=pl.CostEstimate(
            flops=8 * n * c,
            transcendentals=n,
            bytes_accessed=n * c * itemsize + n_pad * 4 + _NCORES * bm * 16),
    )(logits, t)

    # Tiny epilogue in plain JAX: combine per-core / per-row partials.
    p = jnp.sum(out, axis=(0, 1))  # [sum exp(gathered), #known, sum pos unk, #pos unk]
    known_loss = jnp.exp(jnp.float32(1.0)) - p[0] / p[1]
    unknown_loss = -1.0 + jnp.exp(p[2] / p[3])
    return (known_loss + unknown_loss).astype(jnp.float32)


if __name__ == "__main__":
    key = jax.random.PRNGKey(0)
    N, C = 16, 32
    logits = jax.random.normal(key, (N, C), dtype=jnp.float32)
    # 10 known samples (class ids), 6 unknown samples (-1)
    targets = jnp.array([0, 1, 2, 3, 4, 5, 6, 7, 8, 9,
                         -1, -1, -1, -1, -1, -1], dtype=jnp.int32)

    loss = jax.block_until_ready(open_set_loss(logits, targets))

    # numpy reference (same math as the PyTorch module)
    lg = np.asarray(logits)
    tg = np.asarray(targets)
    known = tg != -1
    known_logits = lg[known][np.arange(known.sum()), tg[known]]
    known_loss = np.exp(1.0) - np.exp(known_logits).mean()
    unk = lg[~known].reshape(-1)
    pos = unk[unk > 0]
    unknown_loss = -1.0 + np.exp(pos.mean())
    ref = np.float32(known_loss + unknown_loss)

    assert np.isclose(np.array(loss), ref, rtol=1e-4, atol=1e-4), (loss, ref)
    print("KERNEL_OK")
</pallas_src>

<mosaic_0001>
module attributes {stable_mosaic.version = 11 : i64} {
  func.func @kernel(%arg0: i32, %arg1: i32, %arg2: memref<8x32xf32, #tpu.memory_space<vmem>>, %arg3: memref<8x1xi32, #tpu.memory_space<vmem>>, %arg4: memref<1x8x4xf32, #tpu.memory_space<vmem>>) attributes {dimension_semantics = [#tpu.dimension_semantics<parallel>, #tpu.dimension_semantics<arbitrary>], iteration_bounds = array<i64: 2, 1>, scalar_prefetch = 0 : i64, scratch_operands = 0 : i64, tpu.core_type = #tpu.core_type<tc>, window_params = [{transform_indices = @transform_0, window_bounds = array<i64: 8, 32>}, {transform_indices = @transform_1, window_bounds = array<i64: 8, 1>}, {transform_indices = @transform_2, window_bounds = array<i64: 1, 8, 4>}]} {
    %c0_i32 = arith.constant 0 : i32
    %0 = arith.cmpi eq, %arg1, %c0_i32 : i32
    %1 = arith.extui %0 : i1 to i32
    %c0_i32_0 = arith.constant 0 : i32
    %2 = arith.cmpi ne, %1, %c0_i32_0 : i32
    scf.if %2 {
      %cst_19 = arith.constant 0.000000e+00 : f32
      %67 = vector.broadcast %cst_19 : f32 to vector<8x4xf32>
      %c0_20 = arith.constant 0 : index
      %c0_21 = arith.constant 0 : index
      %c0_22 = arith.constant 0 : index
      %68 = vector.load %arg4[%c0_20, %c0_21, %c0_22] : memref<1x8x4xf32, #tpu.memory_space<vmem>>, vector<1x8x4xf32>
      %69 = vector.shape_cast %68 : vector<1x8x4xf32> to vector<8x4xf32>
      %70 = vector.shape_cast %67 : vector<8x4xf32> to vector<1x8x4xf32>
      tpu.vector_store %arg4[%c0_20, %c0_21, %c0_22], %70 {strides = array<i32>} : memref<1x8x4xf32, #tpu.memory_space<vmem>>, vector<1x8x4xf32>,
    } else {
    }
    %c0 = arith.constant 0 : index
    %c0_1 = arith.constant 0 : index
    %3 = vector.load %arg2[%c0, %c0_1] : memref<8x32xf32, #tpu.memory_space<vmem>>, vector<8x32xf32>
    %c0_2 = arith.constant 0 : index
    %c0_3 = arith.constant 0 : index
    %4 = vector.load %arg3[%c0_2, %c0_3] : memref<8x1xi32, #tpu.memory_space<vmem>>, vector<8x1xi32>
    %c1_i32 = arith.constant 1 : i32
    %5 = arith.muli %arg0, %c1_i32 : i32
    %6 = arith.addi %5, %arg1 : i32
    %c8_i32 = arith.constant 8 : i32
    %7 = arith.muli %6, %c8_i32 : i32
    %8 = tpu.iota {dimensions = array<i32: 0>} : vector<8x1xi32>
    %9 = vector.broadcast %7 : i32 to vector<8x1xi32>
    %10 = arith.addi %9, %8 : vector<8x1xi32>
    %c16_i32 = arith.constant 16 : i32
    %11 = vector.broadcast %c16_i32 : i32 to vector<8x1xi32>
    %12 = arith.cmpi slt, %10, %11 : vector<8x1xi32>
    %c-1_i32 = arith.constant -1 : i32
    %13 = vector.broadcast %c-1_i32 : i32 to vector<8x1xi32>
    %14 = arith.cmpi ne, %4, %13 : vector<8x1xi32>
    %15 = arith.andi %14, %12 : vector<8x1xi1>
    %c-1_i32_4 = arith.constant -1 : i32
    %16 = vector.broadcast %c-1_i32_4 : i32 to vector<8x1xi32>
    %17 = arith.cmpi eq, %4, %16 : vector<8x1xi32>
    %18 = arith.andi %17, %12 : vector<8x1xi1>
    %19 = tpu.iota {dimensions = array<i32: 1>} : vector<8x32xi32>
    %20 = vector.broadcast %4 : vector<8x1xi32> to vector<8x32xi32>
    %21 = arith.cmpi eq, %19, %20 : vector<8x32xi32>
    %cst = arith.constant 0.000000e+00 : f32
    %22 = vector.broadcast %cst : f32 to vector<8x32xf32>
    %23 = arith.select %21, %3, %22 : vector<8x32xi1>, vector<8x32xf32>
    %cst_5 = arith.constant dense<0.000000e+00> : vector<8xf32>
    %24 = vector.multi_reduction <add>, %23, %cst_5 [1] : vector<8x32xf32> to vector<8xf32>
    %25 = vector.shape_cast %24 : vector<8xf32> to vector<8x1xf32>
    %26 = math.exp %25 : vector<8x1xf32>
    %cst_6 = arith.constant 0.000000e+00 : f32
    %27 = vector.broadcast %cst_6 : f32 to vector<8x1xf32>
    %28 = arith.select %15, %26, %27 : vector<8x1xi1>, vector<8x1xf32>
    %29 = arith.extui %15 : vector<8x1xi1> to vector<8x1xi32>
    %30 = arith.sitofp %29 : vector<8x1xi32> to vector<8x1xf32>
    %cst_7 = arith.constant 0.000000e+00 : f32
    %31 = vector.broadcast %cst_7 : f32 to vector<8x32xf32>
    %32 = arith.cmpf ogt, %3, %31 : vector<8x32xf32>
    %33 = vector.broadcast %18 : vector<8x1xi1> to vector<8x32xi1>
    %34 = arith.andi %33, %32 : vector<8x32xi1>
    %cst_8 = arith.constant 0.000000e+00 : f32
    %35 = vector.broadcast %cst_8 : f32 to vector<8x32xf32>
    %36 = arith.select %34, %3, %35 : vector<8x32xi1>, vector<8x32xf32>
    %cst_9 = arith.constant dense<0.000000e+00> : vector<8xf32>
    %37 = vector.multi_reduction <add>, %36, %cst_9 [1] : vector<8x32xf32> to vector<8xf32>
    %38 = vector.shape_cast %37 : vector<8xf32> to vector<8x1xf32>
    %39 = arith.extui %34 : vector<8x32xi1> to vector<8x32xi32>
    %40 = arith.sitofp %39 : vector<8x32xi32> to vector<8x32xf32>
    %cst_10 = arith.constant dense<0.000000e+00> : vector<8xf32>
    %41 = vector.multi_reduction <add>, %40, %cst_10 [1] : vector<8x32xf32> to vector<8xf32>
    %42 = vector.shape_cast %41 : vector<8xf32> to vector<8x1xf32>
    %43 = tpu.iota {dimensions = array<i32: 1>} : vector<8x4xi32>
    %c0_i32_11 = arith.constant 0 : i32
    %44 = vector.broadcast %c0_i32_11 : i32 to vector<8x4xi32>
    %45 = arith.cmpi eq, %43, %44 : vector<8x4xi32>
    %c1_i32_12 = arith.constant 1 : i32
    %46 = vector.broadcast %c1_i32_12 : i32 to vector<8x4xi32>
    %47 = arith.cmpi eq, %43, %46 : vector<8x4xi32>
    %c2_i32 = arith.constant 2 : i32
    %48 = vector.broadcast %c2_i32 : i32 to vector<8x4xi32>
    %49 = arith.cmpi eq, %43, %48 : vector<8x4xi32>
    %50 = vector.shape_cast %38 : vector<8x1xf32> to vector<8x1xf32>
    %51 = vector.broadcast %50 : vector<8x1xf32> to vector<8x4xf32>
    %52 = vector.shape_cast %42 : vector<8x1xf32> to vector<8x1xf32>
    %53 = vector.broadcast %52 : vector<8x1xf32> to vector<8x4xf32>
    %54 = arith.select %49, %51, %53 : vector<8x4xi1>, vector<8x4xf32>
    %55 = vector.shape_cast %30 : vector<8x1xf32> to vector<8x1xf32>
    %56 = vector.broadcast %55 : vector<8x1xf32> to vector<8x4xf32>
    %57 = arith.select %47, %56, %54 : vector<8x4xi1>, vector<8x4xf32>
    %58 = vector.shape_cast %28 : vector<8x1xf32> to vector<8x1xf32>
    %59 = vector.broadcast %58 : vector<8x1xf32> to vector<8x4xf32>
    %60 = arith.select %45, %59, %57 : vector<8x4xi1>, vector<8x4xf32>
    %c0_13 = arith.constant 0 : index
    %c0_14 = arith.constant 0 : index
    %c0_15 = arith.constant 0 : index
    %61 = vector.load %arg4[%c0_13, %c0_14, %c0_15] : memref<1x8x4xf32, #tpu.memory_space<vmem>>, vector<1x8x4xf32>
    %62 = vector.shape_cast %61 : vector<1x8x4xf32> to vector<8x4xf32>
    %63 = arith.addf %62, %60 : vector<8x4xf32>
    %c0_16 = arith.constant 0 : index
    %c0_17 = arith.constant 0 : index
    %c0_18 = arith.constant 0 : index
    %64 = vector.load %arg4[%c0_16, %c0_17, %c0_18] : memref<1x8x4xf32, #tpu.memory_space<vmem>>, vector<1x8x4xf32>
    %65 = vector.shape_cast %64 : vector<1x8x4xf32> to vector<8x4xf32>
    %66 = vector.shape_cast %63 : vector<8x4xf32> to vector<1x8x4xf32>
    tpu.vector_store %arg4[%c0_16, %c0_17, %c0_18], %66 {strides = array<i32>} : memref<1x8x4xf32, #tpu.memory_space<vmem>>, vector<1x8x4xf32>,
    return
  }
  func.func @transform_0(%arg0: i32, %arg1: i32) -> (i32, i32) {
    %c1_i32 = arith.constant 1 : i32
    %0 = arith.muli %arg0, %c1_i32 : i32
    %1 = arith.addi %0, %arg1 : i32
    %c1_i32_0 = arith.constant 1 : i32
    %2 = arith.minsi %1, %c1_i32_0 : i32
    %c0_i32 = arith.constant 0 : i32
    %c0_i32_1 = arith.constant 0 : i32
    return %2, %c0_i32 : i32, i32
  }
  func.func @transform_1(%arg0: i32, %arg1: i32) -> (i32, i32) {
    %c1_i32 = arith.constant 1 : i32
    %0 = arith.muli %arg0, %c1_i32 : i32
    %1 = arith.addi %0, %arg1 : i32
    %c0_i32 = arith.constant 0 : i32
    %c0_i32_0 = arith.constant 0 : i32
    return %1, %c0_i32 : i32, i32
  }
  func.func @transform_2(%arg0: i32, %arg1: i32) -> (i32, i32, i32) {
    %c0_i32 = arith.constant 0 : i32
    %c0_i32_0 = arith.constant 0 : i32
    %c0_i32_1 = arith.constant 0 : i32
    return %arg0, %c0_i32, %c0_i32_0 : i32, i32, i32
  }
}

</mosaic_0001>

<bundles_post_ra>
// kernel: tpu_custom_call.1
= control target key start
LH: loop header
LB: loop body
LE: loop exit
PB: predicated region body
PF: predicated region fallthrough
CT: control target
= control target key end

     0   :  { %s427_s9 = smov 0   ;;  %s429_s10 = smov 0   ;;  %s480_s0 = inlined_call_operand.vmem [shape: f32[16,32], index: 0, kind: input, shape index: {}]   ;;  %s481_s1 = inlined_call_operand.vmem [shape: s32[16,1], index: 1, kind: input, shape index: {}]   ;;  %s482_s2 = inlined_call_operand.vmem [shape: f32[2,8,4], index: 2, kind: output, shape index: {}]  }
   0x1   :  { %s431_s11 = smov 0  }
   0x2 LB: > { %s24_s12 = sadd.s32 1, %s404_s10  ;;  %p344_p0 = scmp.ge.s32.totalorder %s408_s11, 1  ;;  %s408_s11 = sphi %s431_s11, %s12_s11   ;;  %s404_s10 = sphi %s429_s10, %s486_s10   ;;  %s400_s9 = sphi %s427_s9, %s485_s9  }
   0x3   : > { %p26_p1 = scmp.ge.s32.totalorder %s24_s12, 2  ;;  %p148_p2 = scmp.lt.s32.totalorder %s408_s11, 3 }
   0x5   : > { %s488_s12 = smov (%p26_p1, %s24_s12), 0  ;;  %p149_p3 = pnand %p344_p0, %p148_p2 }
   0x6   : > { %p177_p4 = scmp.lt.s32.totalorder (!%p149_p3), %s400_s9, 1  ;;  %s351_s13 = sshll.u32 (!%p149_p3), %s400_s9, 3  ;;  %v206_v0 = vlaneseq (!%p149_p3)  ;;  %v410_v1 = vmov (!%p149_p3), 0   ;;  %vm200_vm3 = vcmask (!%p149_p3), 31744   ;;  %v411_v7 = vmov (!%p149_p3), 0.0  }
   0x7   : > { %152 = sbr.rel (%p149_p3) target bundleno = 438 (0x1b6), region = 28  ;;  %382 = vset.pattern.permute.xlu0 (!%p149_p3), %v410_v1  ;;  %383 = vset.pattern.permute.xlu1 (!%p149_p3), %v410_v1  ;;  %v208_v2 = vstv (!%p149_p3), %s351_s13  ;;  %vm222_vm6 = vcmask (!%p149_p3), 261120  }
   0x8   : > { %v207_v3 = vshrl.u32 (!%p149_p3), %v206_v0, 7  ;;  %v216_v9 = vand.u32 (!%p149_p3), 127, %v206_v0 }
   0xa   : > { %v209_v4 = vadd.s32 (!%p149_p3), %v208_v2, %v207_v3  ;;  %vm249_vm11 = vcmp.eq.s32.totalorder (!%p149_p3), %v216_v9, 2  ;;  %vm248_vm12 = vcmp.eq.s32.totalorder (!%p149_p3), %v216_v9, 1  ;;  %vm247_vm13 = vcmp.eq.s32.totalorder (!%p149_p3), %v216_v9, 0 }
   0xc   : > { %vm210_vm0 = vcmp.lt.s32.totalorder (!%p149_p3), %v209_v4, 16 }
   0xe   : > { %s178_s14 = scalar_select %p177_p4, %s400_s9, 1 }
  0x10   : > { %s349_s15 = sshll.u32 %s178_s14, 3  ;;  %s490_s14 = smov (!%p177_p4, %s178_s14), 1 }
  0x11   : > { %s190_s18 = scalar_lea.vmem %s481_s1, %s349_s15  ;;  %s453_s21 = scalar_lea.vmem %s482_s2, %s349_s15 }
  0x12   : > { %v203_v5 = vld [vmem:[%s190_s18] sm:$0xff]  ;;  %201 = vst.msk [vmem:[%s453_s21] sm:$0xff] %vm200_vm3, %v411_v7  ;;  %s348_s22 = sshll.u32 %s490_s14, 3 }
  0x13   : > { %218 = vperm.xlu0 %382, %v203_v5   ;;  %vm213_vm1 = vcmp.eq.s32.totalorder %v203_v5, 4294967295  ;;  %vm211_vm4 = vcmp.ne.s32.totalorder %v203_v5, 4294967295  ;;  %s182_s25 = scalar_lea.vmem %s480_s0, %s348_s22 }
  0x14   : > { %vm214_vm2 = vmand %vm213_vm1, %vm210_vm0  ;;  %v202_v10 = vld [vmem:[%s182_s25] sm:$0xff] }
  0x15   : > { %v232_v6 = vsel %vm214_vm2, 1, %v410_v1  ;;  %vm457_vm5 = vmand %vm211_vm4, %vm210_vm0  ;;  %vm231_vm8 = vcmp.gt.f32.partialorder %v202_v10, 0.0 }
  0x16   : > { %234 = vperm.xlu1 %383, %v232_v6   ;;  %v352_v19 = vsel %vm457_vm5, 1.0, %v411_v7 }
  0x19   : > { %v263_v28 = vld [vmem:[%s453_s21] sm:$0xff] }
  0x92   : > { %v219_v11 = vpop.permute.xlu0 %218 }
  0x93   : > { %vm220_vm7 = vcmp.eq.s32.totalorder %v216_v9, %v219_v11 }
  0x94   : > { %v221_v12 = vsel %vm220_vm7, %v202_v10, 0.0 }
  0x95   : > { %v235_v13 = vpop.permute.xlu1 %234  ;;  %v223_v14 = vsel %vm222_vm6, %v221_v12, 0.0 }
  0x96   : > { %vm236_vm9 = vcmp.eq.s32.totalorder %v235_v13, 1  ;;  %224 = vadd.xlane.f32.xlu0 %v223_v14 }
  0x97   : > { %vm237_vm10 = vmand %vm236_vm9, %vm231_vm8 }
  0x98   : > { %v353_v15 = vsel %vm237_vm10, 1.0, %v411_v7  ;;  %v238_v16 = vsel %vm237_vm10, %v202_v10, 0.0 }
  0x99   : > { %v244_v17 = vsel %vm222_vm6, %v353_v15, 0.0  ;;  %v239_v18 = vsel %vm222_vm6, %v238_v16, 0.0 }
  0x9a   : > { %245 = vadd.xlane.f32.xlu0 %v244_v17  ;;  %240 = vadd.xlane.f32.xlu1 %v239_v18 }
  0xb0   : > { %253 = vperm.xlu0 %382, %v352_v19  }
 0x123   : > { %v225_v20 = vpop.xlane.xlu0 %224 }
 0x124   : > { %v226_v21 = vmul.f32 1.442695, %v225_v20 }
 0x126   : > { %384 = vpow2.f32 %v226_v21 }
 0x127   : > { %v246_v24 = vpop.xlane.xlu0 %245  ;;  %v241_v25 = vpop.xlane.xlu1 %240 }
 0x128   : > { %v250_v26 = vsel %vm249_vm11, %v241_v25, %v246_v24 }
 0x12f   : > { %v254_v27 = vpop.permute.xlu0 %253 }
 0x130   : > { %v385_v22 = vpop.eup %384  ;;  %v256_v29 = vsel %vm248_vm12, %v254_v27, %v250_v26 }
 0x131   : > { %v228_v23 = vsel %vm457_vm5, %v385_v22, 0.0 }
 0x132   : > { %259 = vperm.xlu1 %383, %v228_v23  }
 0x1b1   : > { %v260_v30 = vpop.permute.xlu1 %259 }
 0x1b2   : > { %v262_v31 = vsel %vm247_vm13, %v260_v30, %v256_v29 }
 0x1b3   : > { %v264_v32 = vadd.f32 %v263_v28, %v262_v31 }
 0x1b5   : > { %266 = vst.msk [vmem:[%s453_s21] sm:$0xff] %vm200_vm3, %v264_v32 }
 0x1b6 PF: > { %s12_s11 = sadd.s32 1, %s408_s11   ;;  %s485_s9 = smov %s404_s10 }
 0x1b7   : > { %p9_p5 = scmp.ge.s32.totalorder %s12_s11, 4   ;;  %s486_s10 = smov %s488_s12 }
 0x1b9   :  { %11 = sbr.rel (!%p9_p5) target bundleno = 2 (0x2), region = 65 }

</bundles_post_ra>
